<compile_context>
chip_gen: v7x
topology: tpu7x:2x2x1
jax: 0.10.0
libtpu: 0.0.40
codegen_flags: <defaults>
</compile_context>

<pallas_src>
import functools

import jax
import jax.numpy as jnp
from jax.experimental import pallas as pl
from jax.experimental.pallas import tpu as pltpu


_LANE = 128   # lane / MXU tile alignment: correct & efficient on v5e/v6e/v7x


def _round_up(v, m):
    return ((v + m - 1) // m) * m


@functools.lru_cache(maxsize=1)
def _device_vmem_bytes():
    """Physical VMEM per TensorCore; conservative fallback if query fails."""
    try:
        return int(pltpu.get_tpu_info().vmem_capacity_bytes)
    except Exception:
        return 64 << 20            # v7x per-TC VMEM (smallest of v5e/v6e/v7x)


def _probe_kernel(x_ref, o_ref):
    o_ref[...] = x_ref[...]


@functools.lru_cache(maxsize=1)
def _supports_single_buffered_weights():
    """One-time probe: does this build accept pipeline_mode=pl.Buffered(1)
    on a constant-index input spec?  Never wraps the real kernel call."""
    try:
        call = pl.pallas_call(
            _probe_kernel,
            out_shape=jax.ShapeDtypeStruct((16, 128), jnp.float32),
            grid_spec=pltpu.PrefetchScalarGridSpec(
                num_scalar_prefetch=0,
                grid=(2,),
                in_specs=[pl.BlockSpec((8, 128), lambda i: (0, 0),
                                       pipeline_mode=pl.Buffered(1))],
                out_specs=pl.BlockSpec((8, 128), lambda i: (i, 0)),
            ),
        )
        jax.block_until_ready(call(jnp.zeros((8, 128), jnp.float32)))
        return True
    except Exception:
        return False


def ffnn_kernel(x_ref, w1_ref, b1_ref, w2_ref, b2_ref, o_ref):
    # x_ref : [tm, D_inp]                  batch tile (pipelined when grid > 1)
    # w1_ref: [D_inp, Hp],  b1_ref: [1, Hp]   resident (single-buffered) weights
    # w2_ref: [Hp, Dop],    b2_ref: [1, Dop]
    # o_ref : [tm, Dop]                    lane-dense output tile
    h = jnp.dot(x_ref[...], w1_ref[...],
                preferred_element_type=jnp.float32) + b1_ref[...]
    h = jnp.maximum(h, 0.0)                                   # ReLU
    w2 = w2_ref[...]
    out = jnp.dot(h.astype(w2.dtype), w2,
                  preferred_element_type=jnp.float32) + b2_ref[...]
    o_ref[...] = out.astype(o_ref.dtype)


def ffnn_forward(x, w1, b1, w2, b2, *, tm=None, mxu_dtype=None):
    """Fused two-layer MLP: relu(x @ w1 + b1) @ w2 + b2."""
    B, D_in = x.shape
    H = w1.shape[1]
    D_out = w2.shape[1]
    assert w1.shape[0] == D_in and w2.shape[0] == H

    out_dtype = x.dtype
    w_dtype = jnp.dtype(mxu_dtype) if mxu_dtype is not None else jnp.dtype(x.dtype)
    x_bytes = w_dtype.itemsize
    o_bytes = jnp.dtype(out_dtype).itemsize

    # Lane-dense / full-MXU padding of every matmul dim, including K = D_in.
    D_inp = _round_up(D_in, _LANE)
    Hp = _round_up(H, _LANE)
    Dop = _round_up(D_out, _LANE)

    sub = 16 if x_bytes < 4 else 8         # sublane packing (bf16 needs 16)

    if tm is None:
        # Single grid step when the whole streamed x/out fits comfortably in
        # VMEM (per-step overhead would dwarf the hidden DMA); otherwise a big
        # MXU-friendly tile so the 128/256-row systolic array stays occupied.
        if B <= 256 or 2 * B * (D_inp * x_bytes + Dop * o_bytes) <= (8 << 20):
            tm = _round_up(B, sub)
        else:
            tm = 256
    tm = _round_up(tm, sub)
    Bp = _round_up(B, tm)                  # pad ragged batches, never a mega-tile
    n_steps = Bp // tm

    # Pre-cast x in the wrapper (halves x HBM traffic on the bf16 path) and
    # zero-pad: padded K columns / H rows / N columns contribute exactly 0.
    xp = jnp.pad(x.astype(w_dtype), ((0, Bp - B), (0, D_inp - D_in)))
    w1p = jnp.pad(w1, ((0, D_inp - D_in), (0, Hp - H))).astype(w_dtype)
    b1p = jnp.pad(b1.reshape(1, H), ((0, 0), (0, Hp - H))).astype(jnp.float32)
    w2p = jnp.pad(w2, ((0, Hp - H), (0, Dop - D_out))).astype(w_dtype)
    b2p = jnp.pad(b2.reshape(1, D_out),
                  ((0, 0), (0, Dop - D_out))).astype(jnp.float32)

    single_buf = _supports_single_buffered_weights()
    wmode = {"pipeline_mode": pl.Buffered(1)} if single_buf else {}
    in_specs = [
        pl.BlockSpec((tm, D_inp), lambda i: (i, 0)),             # x tile
        pl.BlockSpec((D_inp, Hp), lambda i: (0, 0), **wmode),    # W1 (resident)
        pl.BlockSpec((1, Hp),     lambda i: (0, 0), **wmode),    # b1
        pl.BlockSpec((Hp, Dop),   lambda i: (0, 0), **wmode),    # W2 (resident)
        pl.BlockSpec((1, Dop),    lambda i: (0, 0), **wmode),    # b2
    ]
    out_specs = pl.BlockSpec((tm, Dop), lambda i: (i, 0))

    # Hardware-aware VMEM budget (never above ~85% of physical VMEM).
    wbuf = 1 if single_buf else 2
    w_bytes = w_dtype.itemsize
    vmem_needed = (
        2 * tm * D_inp * x_bytes                         # x tiles (double-buffered)
        + 2 * tm * Dop * o_bytes                         # out tiles (double-buffered)
        + wbuf * (D_inp * Hp + Hp * Dop) * w_bytes       # weights
        + wbuf * (Hp + Dop) * 4                          # biases (f32)
        + tm * (Hp + Dop) * 4                            # h intermediate + f32 acc
    )
    vmem_cap = int(_device_vmem_bytes() * 0.85)
    vmem_limit = min(max(int(vmem_needed * 1.25) + (2 << 20), 16 << 20), vmem_cap)

    # Split the batch across TensorCores only when the streamed x/out bytes
    # exceed the weight bytes each core would duplicate into its private VMEM.
    stream_bytes = Bp * (D_inp * x_bytes + Dop * o_bytes)
    weight_bytes = (D_inp * Hp + Hp * Dop) * w_bytes
    sem = "parallel" if (n_steps >= 2 and stream_bytes >= weight_bytes) else "arbitrary"

    call = pl.pallas_call(
        ffnn_kernel,
        out_shape=jax.ShapeDtypeStruct((Bp, Dop), out_dtype),
        grid_spec=pltpu.PrefetchScalarGridSpec(
            num_scalar_prefetch=0,
            grid=(n_steps,),
            in_specs=in_specs,
            out_specs=out_specs,
        ),
        compiler_params=pltpu.CompilerParams(
            dimension_semantics=(sem,),
            vmem_limit_bytes=vmem_limit,
        ),
    )
    out = call(xp, w1p, b1p, w2p, b2p)
    return out[:B, :D_out]


def reference_forward(x, w1, b1, w2, b2):
    hp = jax.lax.Precision.HIGHEST
    h = jnp.maximum(jnp.dot(x, w1, precision=hp) + b1.reshape(1, -1), 0.0)
    return jnp.dot(h, w2, precision=hp) + b2.reshape(1, -1)


if __name__ == "__main__":
    # cfg.input_size=32, cfg.hidden_size=64, cfg.output_size=16; batch=64.
    # At this size the wrapper picks a single grid step (tm = B = 64) with
    # D_in/H/D_out padded to 128-lane tiles.
    B, D_in, H, D_out = 64, 32, 64, 16

    key = jax.random.PRNGKey(0)
    kx, kw1, kb1, kw2, kb2 = jax.random.split(key, 5)

    x = jax.random.normal(kx, (B, D_in), dtype=jnp.float32)
    w1 = jax.random.uniform(kw1, (D_in, H), jnp.float32, -1.0, 1.0) / jnp.sqrt(D_in)
    b1 = jax.random.uniform(kb1, (H,), jnp.float32, -1.0, 1.0) / jnp.sqrt(D_in)
    w2 = jax.random.uniform(kw2, (H, D_out), jnp.float32, -1.0, 1.0) / jnp.sqrt(H)
    b2 = jax.random.uniform(kb2, (D_out,), jnp.float32, -1.0, 1.0) / jnp.sqrt(H)

    ref = reference_forward(x, w1, b1, w2, b2)

    # f32 path (strict check).
    out = jax.block_until_ready(ffnn_forward(x, w1, b1, w2, b2))
    assert out.shape == (B, D_out)
    assert jnp.allclose(out, ref, atol=1e-4, rtol=1e-4), "f32 mismatch vs reference"

    # bf16 MXU-input path (x/W pre-cast in wrapper, f32 accumulation).
    out_bf16 = jax.block_until_ready(
        ffnn_forward(x, w1, b1, w2, b2, mxu_dtype=jnp.bfloat16))
    assert out_bf16.shape == (B, D_out)
    assert jnp.allclose(out_bf16, ref, atol=5e-2, rtol=5e-2), "bf16 mismatch"

    print("KERNEL_OK")
</pallas_src>

<mosaic_0001>
module attributes {stable_mosaic.version = 11 : i64} {
  func.func @_probe_kernel(%arg0: i32, %arg1: memref<8x128xf32, #tpu.memory_space<vmem>>, %arg2: memref<8x128xf32, #tpu.memory_space<vmem>>) attributes {dimension_semantics = [#tpu.dimension_semantics<arbitrary>], iteration_bounds = array<i64: 2>, scalar_prefetch = 0 : i64, scratch_operands = 0 : i64, tpu.core_type = #tpu.core_type<tc>, window_params = [{pipeline_mode = #tpu.pipeline_mode<synchronous>, transform_indices = @transform_0, window_bounds = array<i64: 8, 128>}, {transform_indices = @transform_1, window_bounds = array<i64: 8, 128>}]} {
    %c0 = arith.constant 0 : index
    %c0_0 = arith.constant 0 : index
    %0 = vector.load %arg1[%c0, %c0_0] : memref<8x128xf32, #tpu.memory_space<vmem>>, vector<8x128xf32>
    %c0_1 = arith.constant 0 : index
    %c0_2 = arith.constant 0 : index
    %1 = vector.load %arg2[%c0_1, %c0_2] : memref<8x128xf32, #tpu.memory_space<vmem>>, vector<8x128xf32>
    tpu.vector_store %arg2[%c0_1, %c0_2], %0 {strides = array<i32>} : memref<8x128xf32, #tpu.memory_space<vmem>>, vector<8x128xf32>,
    return
  }
  func.func @transform_0(%arg0: i32) -> (i32, i32) {
    %c0_i32 = arith.constant 0 : i32
    %c0_i32_0 = arith.constant 0 : i32
    %c0_i32_1 = arith.constant 0 : i32
    return %c0_i32, %c0_i32_0 : i32, i32
  }
  func.func @transform_1(%arg0: i32) -> (i32, i32) {
    %c0_i32 = arith.constant 0 : i32
    %c0_i32_0 = arith.constant 0 : i32
    return %arg0, %c0_i32 : i32, i32
  }
}

module attributes {stable_mosaic.version = 11 : i64} {
  func.func @ffnn_kernel(%arg0: i32, %arg1: memref<64x128xf32, #tpu.memory_space<vmem>>, %arg2: memref<128x128xf32, #tpu.memory_space<vmem>>, %arg3: memref<1x128xf32, #tpu.memory_space<vmem>>, %arg4: memref<128x128xf32, #tpu.memory_space<vmem>>, %arg5: memref<1x128xf32, #tpu.memory_space<vmem>>, %arg6: memref<64x128xf32, #tpu.memory_space<vmem>>) attributes {dimension_semantics = [#tpu.dimension_semantics<arbitrary>], iteration_bounds = array<i64: 1>, scalar_prefetch = 0 : i64, scratch_operands = 0 : i64, tpu.core_type = #tpu.core_type<tc>, window_params = [{transform_indices = @transform_0, window_bounds = array<i64: 64, 128>}, {pipeline_mode = #tpu.pipeline_mode<synchronous>, transform_indices = @transform_1, window_bounds = array<i64: 128, 128>}, {pipeline_mode = #tpu.pipeline_mode<synchronous>, transform_indices = @transform_2, window_bounds = array<i64: 1, 128>}, {pipeline_mode = #tpu.pipeline_mode<synchronous>, transform_indices = @transform_3, window_bounds = array<i64: 128, 128>}, {pipeline_mode = #tpu.pipeline_mode<synchronous>, transform_indices = @transform_4, window_bounds = array<i64: 1, 128>}, {transform_indices = @transform_5, window_bounds = array<i64: 64, 128>}]} {
    %c0 = arith.constant 0 : index
    %c0_0 = arith.constant 0 : index
    %0 = vector.load %arg1[%c0, %c0_0] : memref<64x128xf32, #tpu.memory_space<vmem>>, vector<64x128xf32>
    %c0_1 = arith.constant 0 : index
    %c0_2 = arith.constant 0 : index
    %1 = vector.load %arg2[%c0_1, %c0_2] : memref<128x128xf32, #tpu.memory_space<vmem>>, vector<128x128xf32>
    %cst = arith.constant dense<0.000000e+00> : vector<64x128xf32>
    %2 = tpu.matmul %0, %1, %cst {dimension_numbers = #tpu.dot_dimension_numbers<[1], [0], [0], [1], [0, 0, 1, 1], [], []>} : vector<64x128xf32>, vector<128x128xf32>, vector<64x128xf32> -> vector<64x128xf32>
    %c0_3 = arith.constant 0 : index
    %c0_4 = arith.constant 0 : index
    %3 = vector.load %arg3[%c0_3, %c0_4] : memref<1x128xf32, #tpu.memory_space<vmem>>, vector<1x128xf32>
    %4 = vector.broadcast %3 : vector<1x128xf32> to vector<64x128xf32>
    %5 = arith.addf %2, %4 : vector<64x128xf32>
    %cst_5 = arith.constant 0.000000e+00 : f32
    %6 = vector.broadcast %cst_5 : f32 to vector<64x128xf32>
    %7 = arith.maximumf %5, %6 : vector<64x128xf32>
    %c0_6 = arith.constant 0 : index
    %c0_7 = arith.constant 0 : index
    %8 = vector.load %arg4[%c0_6, %c0_7] : memref<128x128xf32, #tpu.memory_space<vmem>>, vector<128x128xf32>
    %cst_8 = arith.constant dense<0.000000e+00> : vector<64x128xf32>
    %9 = tpu.matmul %7, %8, %cst_8 {dimension_numbers = #tpu.dot_dimension_numbers<[1], [0], [0], [1], [0, 0, 1, 1], [], []>} : vector<64x128xf32>, vector<128x128xf32>, vector<64x128xf32> -> vector<64x128xf32>
    %c0_9 = arith.constant 0 : index
    %c0_10 = arith.constant 0 : index
    %10 = vector.load %arg5[%c0_9, %c0_10] : memref<1x128xf32, #tpu.memory_space<vmem>>, vector<1x128xf32>
    %11 = vector.broadcast %10 : vector<1x128xf32> to vector<64x128xf32>
    %12 = arith.addf %9, %11 : vector<64x128xf32>
    %c0_11 = arith.constant 0 : index
    %c0_12 = arith.constant 0 : index
    %13 = vector.load %arg6[%c0_11, %c0_12] : memref<64x128xf32, #tpu.memory_space<vmem>>, vector<64x128xf32>
    tpu.vector_store %arg6[%c0_11, %c0_12], %12 {strides = array<i32>} : memref<64x128xf32, #tpu.memory_space<vmem>>, vector<64x128xf32>,
    return
  }
  func.func @transform_0(%arg0: i32) -> (i32, i32) {
    %c0_i32 = arith.constant 0 : i32
    %c0_i32_0 = arith.constant 0 : i32
    return %arg0, %c0_i32 : i32, i32
  }
  func.func @transform_1(%arg0: i32) -> (i32, i32) {
    %c0_i32 = arith.constant 0 : i32
    %c0_i32_0 = arith.constant 0 : i32
    %c0_i32_1 = arith.constant 0 : i32
    return %c0_i32, %c0_i32_0 : i32, i32
  }
  func.func @transform_2(%arg0: i32) -> (i32, i32) {
    %c0_i32 = arith.constant 0 : i32
    %c0_i32_0 = arith.constant 0 : i32
    %c0_i32_1 = arith.constant 0 : i32
    return %c0_i32, %c0_i32_0 : i32, i32
  }
  func.func @transform_3(%arg0: i32) -> (i32, i32) {
    %c0_i32 = arith.constant 0 : i32
    %c0_i32_0 = arith.constant 0 : i32
    %c0_i32_1 = arith.constant 0 : i32
    return %c0_i32, %c0_i32_0 : i32, i32
  }
  func.func @transform_4(%arg0: i32) -> (i32, i32) {
    %c0_i32 = arith.constant 0 : i32
    %c0_i32_0 = arith.constant 0 : i32
    %c0_i32_1 = arith.constant 0 : i32
    return %c0_i32, %c0_i32_0 : i32, i32
  }
  func.func @transform_5(%arg0: i32) -> (i32, i32) {
    %c0_i32 = arith.constant 0 : i32
    %c0_i32_0 = arith.constant 0 : i32
    return %arg0, %c0_i32 : i32, i32
  }
}

</mosaic_0001>

<bundles_post_ra>
// kernel: tpu_custom_call.1
= control target key start
LH: loop header
LB: loop body
LE: loop exit
PB: predicated region body
PF: predicated region fallthrough
CT: control target
= control target key end

     0   :  { %6 = vsyncpa [#allocation3], 0  ;;  %s481_s0 = inlined_call_operand.hbm [shape: f32[8,128], index: 0, kind: input, shape index: {}]   ;;  %s482_s1 = inlined_call_operand.hbm [shape: f32[16,128], index: 1, kind: output, shape index: {}]  }
   0x1   :  { %7 = vsyncpa [#allocation4], 0 }
   0x2   :  { %9 = vsyncpa [#allocation4 + $0x1], 0  ;;  %s351_s6 = smov 0   ;;  %s353_s7 = smov 0  }
   0x3   :  { %s355_s8 = smov 0   ;;  %s357_s9 = smov 0  }
   0x4 LB: > { %s372_s10 = sadd.s32 4294967295, %s337_s9   ;;  %s183_s11 = sadd.s32 4294967294, %s337_s9   ;;  %s337_s9 = sphi %s357_s9, %s498_s9   ;;  %s333_s8 = sphi %s355_s8, %s497_s8   ;;  %s329_s7 = sphi %s353_s7, %s496_s7   ;;  %s325_s6 = sphi %s351_s6, %s495_s6  }
   0x5   : > { %s376_s12 = sadd.s32 1, %s337_s9   ;;  %s43_s13 = sadd.s32 1, %s333_s8 }
   0x6   : > { %s40_s14 = ssub.s32 %s337_s9, %s376_s12  ;;  %p53_p0 = scmp.ne.s32.totalorder %s333_s8, %s329_s7 }
   0x7   : > { %p41_p1 = scmp.eq.s32.totalorder %s40_s14, 0  ;;  %p54_p2 = scmp.eq.s32.totalorder %s372_s10, 1 }
   0x8   : > { %p59_p3 = scmp.ne.s32.totalorder %s329_s7, %s325_s6  ;;  %p60_p4 = scmp.eq.s32.totalorder %s183_s11, 1 }
   0x9   : > { %s387_s15 = scalar_select %p41_p1, %s333_s8, %s43_s13  }
   0xa   : > { %p389_p5 = por %p54_p2, %p53_p0  ;;  %p393_p6 = por %p60_p4, %p59_p3 }
   0xb   : > { %p184_p7 = scmp.ge.s32.totalorder %s337_s9, 1  ;;  %p67_p8 = scmp.lt.s32.totalorder %s337_s9, 3 }
   0xc   : > { %s486_s16 = scalar_select %p389_p5, 1, 0 }
   0xd   : > { %s487_s17 = scalar_select %p393_p6, 1, 0 }
   0xe   : > { %p483_p9 = scmp.eq.s32.totalorder %s372_s10, 0  ;;  %p400_p10 = pnand %p184_p7, %p67_p8 }
   0xf   : > { %s339_s19 = smov [#allocation2]   ;;  %s243_s24 = scalar_lea.hbm %s481_s0, 128 }
  0x10   : > { %s488_s18 = scalar_select %p400_p10, 1, 0 }
  0x11   : > { %s80_s20 = sshll.u32 %s339_s19, 4  ;;  %p199_p11 = pneg %p400_p10  ;;  %s81_s20 = int_to_ptr.vmem [resolvable:$true] %s80_s20 }
  0x12   : > { %p244_p13 = scmp.ne.s32.totalorder %s481_s0, %s243_s24  ;;  %p250_p3 = scmp.lt.u32.totalorder %s243_s24, %s481_s0 }
  0x13   : > { %p408_p12 = pnand %p483_p9, %p199_p11 }
  0x15   : > { %p245_p0 = pneg %p408_p12 }
  0x17   : > { %p246_p1 = pnand %p245_p0, %p244_p13 }
  0x19   : > { %p247_p2 = pneg %p246_p1 }
  0x1b   : > { %p252_p4 = pnand %p250_p3, %p247_p2 }
  0x1d   : > { %255 = shalt.err (!%p252_p4)
}
  0x1e   : > { %s256_s29 = scalar_lea.vmem %s81_s20, 128  ;;  %p264_p9 = scmp.lt.s32.totalorder %s81_s20, %s81_s20 }
  0x1f   : > { %p257_p7 = scmp.ne.s32.totalorder %s81_s20, %s256_s29  ;;  %p265_p6 = scmp.lt.s32.totalorder %s256_s29, %s256_s29 }
  0x21   : > { %p259_p8 = pnand %p257_p7, %p245_p0  ;;  %p266_p5 = por %p265_p6, %p264_p9 }
  0x23   : > { %p260_p11 = pneg %p259_p8 }
  0x25   : > { %p267_p10 = pnand %p266_p5, %p260_p11 }
  0x27   : > { %270 = shalt.err (!%p267_p10)
}
  0x28   : > { %202 = dma.hbm_to_vmem [thread:$0]  (!%p408_p12), %s481_s0, 128, %s81_s20, [#allocation3]  }
  0x29   : > { %p490_p13 = scmp.ne.s32.totalorder %s488_s18, 0 }
  0x2a   : > { %p491_p1 = scmp.eq.s32.totalorder (!%p490_p13), %s372_s10, 0 }
  0x2b   : > { %93 = sbr.rel (%p490_p13) target bundleno = 77 (0x4d), region = 24 }
  0x32   : > { %316 = dma.done.wait (%p491_p1), [#allocation3], 128   ;;  %p492_p0 = pmov %p491_p1 }
  0x33   : > { %s105_s3 = sand.u32 1, %s329_s7   ;;  %s190_s13 = sshll.u32 %s372_s10, 7  ;;  %v108_v0 = vld [vmem:[#allocation2] sm:$0xff] }
  0x34   : > { %318 = vsyncadd (%p492_p0), [#allocation3], 4294967168  ;;  %s188_s4 = sshll.u32 %s105_s3, 3  ;;  %s441_s18 = scalar_lea.hbm %s482_s1, %s190_s13 }
  0x35   : > { %s107_s5 = scalar_lea.vmem [#allocation5], %s188_s4  ;;  %s111_s20 = scalar_lea.sflag [#allocation4], %s105_s3 }
  0x36   : > { %s124_s11 = sshll.u32 %s107_s5, 4  ;;  %109 = vst [vmem:[%s107_s5] sm:$0xff] %v108_v0  ;;  %p493_p6 = scmp.ne.s32.totalorder %s486_s16, 0  ;;  %s436_s11 = int_to_ptr.vmem [resolvable:$true] %s124_s11 }
  0x37   : > { %s271_s21 = scalar_lea.vmem %s436_s11, 128  ;;  %s340_s22 = smov [#allocation5]  }
  0x38   : > { %p272_p5 = scmp.ne.s32.totalorder %s436_s11, %s271_s21  ;;  %s275_s10 = sshll.u32 %s340_s22, 4  ;;  %s276_s10 = int_to_ptr.vmem [resolvable:$false] %s275_s10 }
  0x39   : > { %s277_s23 = scalar_lea.vmem %s276_s10, 256  ;;  %p278_p12 = scmp.lt.s32.totalorder %s436_s11, %s276_s10 }
  0x3a   : > { %p273_p9 = pnand %p272_p5, %p493_p6  ;;  %p279_p2 = scmp.lt.s32.totalorder %s277_s23, %s271_s21 }
  0x3c   : > { %p274_p10 = pneg %p273_p9  ;;  %p280_p3 = por %p279_p2, %p278_p12 }
  0x3e   : > { %p281_p4 = pnand %p280_p3, %p274_p10 }
  0x40   : > { %284 = shalt.err (!%p281_p4)
}
  0x41   : > { %s285_s24 = scalar_lea.hbm %s441_s18, 128  ;;  %s289_s27 = scalar_lea.hbm %s482_s1, 256 }
  0x42   : > { %p286_p7 = scmp.ne.s32.totalorder %s441_s18, %s285_s24  ;;  %p290_p13 = scmp.lt.u32.totalorder %s441_s18, %s482_s1 }
  0x43   : > { %p291_p1 = scmp.lt.u32.totalorder %s289_s27, %s285_s24  ;;  %p293_p5 = scmp.lt.u32.totalorder %s285_s24, %s441_s18 }
  0x44   : > { %p287_p8 = pnand %p286_p7, %p493_p6 }
  0x45   : > { %p292_p0 = por %p291_p1, %p290_p13 }
  0x46   : > { %p288_p11 = pneg %p287_p8 }
  0x47   : > { %p294_p9 = por %p293_p5, %p292_p0 }
  0x49   : > { %p295_p10 = pnand %p294_p9, %p288_p11 }
  0x4b   : > { %298 = shalt.err (!%p295_p10)
}
  0x4c   : > { %197 = dma.vmem_to_hbm [thread:$0]  (%p493_p6), %s436_s11, 128, %s441_s18, %s111_s20  }
  0x4d PF: > { %p209_p12 = scmp.ge.s32.totalorder %s337_s9, 2  ;;  %s136_s30 = sand.u32 1, %s325_s6  }
  0x4e   : > { %p494_p2 = scmp.ne.s32.totalorder %s487_s17, 0  ;;  %s137_s2 = scalar_lea.sflag [#allocation4], %s136_s30 }
  0x50   : > { %p204_p3 = pnand %p209_p12, %p494_p2 }
  0x52   : > { %320 = dma.done.wait (!%p204_p3), %s137_s2, 128  }
  0x53   : > { %322 = vsyncadd (!%p204_p3), %s137_s2, 4294967168  ;;  %p12_p4 = scmp.ge.s32.totalorder %s376_s12, 4   ;;  %s495_s6 = smov %s329_s7 }
  0x54   : > { %s496_s7 = smov %s333_s8  ;;  %s497_s8 = smov %s387_s15 }
  0x55   : > { %s498_s9 = smov %s376_s12  ;;  %14 = sbr.rel (!%p12_p4) target bundleno = 4 (0x4), region = 61 }
  0x5c   :  { %142 = vsyncpa [#allocation3], 1 }
  0x5d   :  { %144 = vsyncpa [#allocation3 + $0x1], 1 }
  0x5e   :  { %145 = vsyncpa [#allocation4], 1 }
  0x5f   :  { %147 = vsyncpa [#allocation4 + $0x1], 1 }

// kernel: tpu_custom_call.1
= control target key start
LH: loop header
LB: loop body
LE: loop exit
PB: predicated region body
PF: predicated region fallthrough
CT: control target
= control target key end

     0   :  { %10 = vsyncpa [#allocation3], 0  ;;  %s771_s0 = inlined_call_operand.hbm [shape: f32[64,128], index: 0, kind: input, shape index: {}]   ;;  %s772_s1 = inlined_call_operand.hbm [shape: f32[128,128], index: 1, kind: input, shape index: {}]   ;;  %s773_s2 = inlined_call_operand.vmem [shape: f32[1,128], index: 2, kind: input, shape index: {}]   ;;  %s774_s3 = inlined_call_operand.hbm [shape: f32[128,128], index: 3, kind: input, shape index: {}]   ;;  %s775_s4 = inlined_call_operand.vmem [shape: f32[1,128], index: 4, kind: input, shape index: {}]   ;;  %s776_s5 = inlined_call_operand.hbm [shape: f32[64,128], index: 5, kind: output, shape index: {}]  }
   0x1   :  { %11 = vsyncpa [#allocation6], 0 }
   0x2   :  { %12 = vsyncpa [#allocation4], 0  ;;  %s662_s18 = smov [#allocation5]   ;;  %s663_s20 = smov [#allocation2]  }
   0x3   :  { %s30_s19 = sshll.u32 %s662_s18, 4  ;;  %s18_s21 = sshll.u32 %s663_s20, 4  ;;  %s31_s19 = int_to_ptr.vmem [resolvable:$true] %s30_s19  ;;  %s698_s21 = int_to_ptr.vmem [resolvable:$true] %s18_s21 }
   0x4   :  { %s568_s24 = scalar_lea.hbm %s772_s1, 2048 }
   0x5   :  { %p569_p0 = scmp.ne.s32.totalorder %s772_s1, %s568_s24  ;;  %p572_p1 = scmp.lt.u32.totalorder %s568_s24, %s772_s1 }
   0x7   :  { %p574_p2 = pnand %p572_p1, %p569_p0 }
   0x9   :  { %577 = shalt.err (!%p574_p2)
}
   0xa   :  { %s578_s29 = scalar_lea.vmem %s31_s19, 2048  ;;  %p583_p4 = scmp.lt.s32.totalorder %s31_s19, %s31_s19 }
   0xb   :  { %p579_p3 = scmp.ne.s32.totalorder %s31_s19, %s578_s29  ;;  %p584_p5 = scmp.lt.s32.totalorder %s578_s29, %s578_s29 }
   0xd   :  { %p585_p6 = por %p584_p5, %p583_p4 }
   0xf   :  { %p586_p7 = pnand %p585_p6, %p579_p3 }
  0x11   :  { %589 = shalt.err (!%p586_p7)
}
  0x12   :  { %s664_s30 = smov 128   ;;  %s665_s6 = smov 8  }
  0x13   :  { %36 = dma.hbm_to_vmem [thread:$0]  %s772_s1, 2048, %s31_s19, [#allocation6], %s664_s30, %s664_s30, %s665_s6  }
  0x14   :  { %s590_s11 = scalar_lea.hbm %s771_s0, 1024 }
  0x15   :  { %p591_p8 = scmp.ne.s32.totalorder %s771_s0, %s590_s11  ;;  %p594_p9 = scmp.lt.u32.totalorder %s590_s11, %s771_s0 }
  0x17   :  { %p596_p10 = pnand %p594_p9, %p591_p8 }
  0x19   :  { %599 = shalt.err (!%p596_p10)
}
  0x1a   :  { %s600_s16 = scalar_lea.vmem %s698_s21, 1024  ;;  %p605_p12 = scmp.lt.s32.totalorder %s698_s21, %s698_s21 }
  0x1b   :  { %p601_p11 = scmp.ne.s32.totalorder %s698_s21, %s600_s16  ;;  %p606_p13 = scmp.lt.s32.totalorder %s600_s16, %s600_s16 }
  0x1d   :  { %p607_p0 = por %p606_p13, %p605_p12 }
  0x1f   :  { %p608_p1 = pnand %p607_p0, %p601_p11 }
  0x21   :  { %611 = shalt.err (!%p608_p1)
}
  0x22   :  { %24 = dma.hbm_to_vmem [thread:$0]  %s771_s0, 1024, %s698_s21, [#allocation3], %s664_s30, %s664_s30, %s665_s6  }
  0x23   :  { %s666_s18 = smov [#allocation7]   ;;  %s612_s23 = scalar_lea.hbm %s774_s3, 2048 }
  0x24   :  { %s44_s19 = sshll.u32 %s666_s18, 4  ;;  %p613_p2 = scmp.ne.s32.totalorder %s774_s3, %s612_s23  ;;  %s45_s19 = int_to_ptr.vmem [resolvable:$true] %s44_s19 }
  0x25   :  { %p616_p3 = scmp.lt.u32.totalorder %s612_s23, %s774_s3 }
  0x27   :  { %p618_p4 = pnand %p616_p3, %p613_p2 }
  0x29   :  { %621 = shalt.err (!%p618_p4)
}
  0x2a   :  { %s622_s28 = scalar_lea.vmem %s45_s19, 2048  ;;  %p627_p6 = scmp.lt.s32.totalorder %s45_s19, %s45_s19 }
  0x2b   :  { %p623_p5 = scmp.ne.s32.totalorder %s45_s19, %s622_s28  ;;  %p628_p7 = scmp.lt.s32.totalorder %s622_s28, %s622_s28 }
  0x2d   :  { %p629_p8 = por %p628_p7, %p627_p6 }
  0x2f   :  { %p630_p9 = pnand %p629_p8, %p623_p5 }
  0x31   :  { %633 = shalt.err (!%p630_p9)
}
  0x32   :  { %50 = dma.hbm_to_vmem [thread:$0]  %s774_s3, 2048, %s45_s19, [#allocation6], %s664_s30, %s664_s30, %s665_s6  }
  0x33   :  { %656 = dma.done.wait [#allocation3], 1024  }
  0x34   :  { %657 = vsyncadd [#allocation3], 4294966272 }
  0x35   :  { %658 = dma.done.wait [#allocation6], 4096  }
  0x36   :  { %659 = vsyncadd [#allocation6], 4294963200  ;;  %v70_v0 = vld [vmem:[#allocation5] sm:$0xff]  ;;  %v71_v1 = vld [vmem:[#allocation5 + $0x8] sm:$0xff]  ;;  %s667_s8 = smov [#allocation8]  }
  0x37   :  { %v72_v2 = vld [vmem:[#allocation5 + $0x10] sm:$0xff]  ;;  %v498_v3 = vpack.c.bf16 %v71_v1, %v70_v0  ;;  %v73_v4 = vld [vmem:[#allocation5 + $0x18] sm:$0xff]  ;;  %v74_v6 = vld [vmem:[#allocation5 + $0x20] sm:$0xff]  ;;  %s347_s9 = sshll.u32 %s667_s8, 4  ;;  %s348_s9 = int_to_ptr.vmem [resolvable:$true] %s347_s9 }
  0x38   :  { %v502_v5 = vpack.c.bf16 %v73_v4, %v72_v2  ;;  %v75_v7 = vld [vmem:[#allocation5 + $0x28] sm:$0xff]  ;;  %v62_v9 = vld [vmem:[#allocation2] sm:$0xff]  ;;  %v76_v10 = vld [vmem:[#allocation5 + $0x30] sm:$0xff]  ;;  %p639_p11 = scmp.lt.s32.totalorder %s348_s9, %s348_s9 }
  0x39   :  { %499 = vmatprep.subr.bf16.mxu0 %v498_v3  ;;  %v506_v8 = vpack.c.bf16 %v75_v7, %v74_v6  ;;  %v77_v11 = vld [vmem:[#allocation5 + $0x38] sm:$0xff]  ;;  %442 = vmatprep.mubr.f32.mxu0 %v62_v9  ;;  %v206_v12 = vld [vmem:[#allocation7] sm:$0xff]  ;;  %v207_v13 = vld [vmem:[#allocation7 + $0x8] sm:$0xff] }
  0x3a   :  { %501 = vmatpush3.bf16.msra.mxu0 %v498_v3  ;;  %v208_v14 = vld [vmem:[#allocation7 + $0x10] sm:$0xff]  ;;  %v510_v15 = vpack.c.bf16 %v77_v11, %v76_v10  ;;  %v78_v16 = vld [vmem:[#allocation5 + $0x40] sm:$0xff]  ;;  %v530_v17 = vpack.c.bf16 %v207_v13, %v206_v12  ;;  %v209_v18 = vld [vmem:[#allocation7 + $0x18] sm:$0xff] }
  0x3b   :  { %503 = vmatprep.subr.bf16.mxu0 %v502_v5  ;;  %v79_v19 = vld [vmem:[#allocation5 + $0x48] sm:$0xff]  ;;  %v534_v20 = vpack.c.bf16 %v209_v18, %v208_v14  ;;  %v210_v21 = vld [vmem:[#allocation7 + $0x20] sm:$0xff]  ;;  %v80_v24 = vld [vmem:[#allocation5 + $0x50] sm:$0xff] }
  0x3c   :  { %v211_v22 = vld [vmem:[#allocation7 + $0x28] sm:$0xff]  ;;  %531 = vmatprep.subr.bf16.mxu1 %v530_v17  ;;  %v514_v23 = vpack.c.bf16 %v79_v19, %v78_v16  ;;  %v81_v26 = vld [vmem:[#allocation5 + $0x58] sm:$0xff]  ;;  %v212_v27 = vld [vmem:[#allocation7 + $0x30] sm:$0xff] }
  0x3d   :  { %533 = vmatpush3.bf16.msra.mxu1 %v530_v17  ;;  %v538_v25 = vpack.c.bf16 %v211_v22, %v210_v21  ;;  %v213_v28 = vld [vmem:[#allocation7 + $0x38] sm:$0xff]  ;;  %v518_v29 = vpack.c.bf16 %v81_v26, %v80_v24  ;;  %v82_v30 = vld [vmem:[#allocation5 + $0x60] sm:$0xff]  ;;  %v83_v32 = vld [vmem:[#allocation5 + $0x68] sm:$0xff] }
  0x3e   :  { %505 = vmatpush3.bf16.msra.mxu0 %v502_v5  ;;  %535 = vmatprep.subr.bf16.mxu1 %v534_v20  ;;  %v542_v31 = vpack.c.bf16 %v213_v28, %v212_v27  ;;  %v214_v33 = vld [vmem:[#allocation7 + $0x40] sm:$0xff]  ;;  %v215_v34 = vld [vmem:[#allocation7 + $0x48] sm:$0xff]  ;;  %v522_v35 = vpack.c.bf16 %v83_v32, %v82_v30  ;;  %v84_v36 = vld [vmem:[#allocation5 + $0x70] sm:$0xff] }
  0x3f   :  { %507 = vmatprep.subr.bf16.mxu0 %v506_v8  ;;  %v546_v37 = vpack.c.bf16 %v215_v34, %v214_v33  ;;  %v85_v38 = vld [vmem:[#allocation5 + $0x78] sm:$0xff]  ;;  %v216_v39 = vld [vmem:[#allocation7 + $0x50] sm:$0xff]  ;;  %v218_v43 = vld [vmem:[#allocation7 + $0x60] sm:$0xff] }
  0x40   :  { %v217_v40 = vld [vmem:[#allocation7 + $0x58] sm:$0xff]  ;;  %v526_v41 = vpack.c.bf16 %v85_v38, %v84_v36  ;;  %v219_v44 = vld [vmem:[#allocation7 + $0x68] sm:$0xff]  ;;  %v64_v47 = vld [vmem:[#allocation2 + $0x10] sm:$0xff] }
  0x41   :  { %537 = vmatpush3.bf16.msra.mxu1 %v534_v20  ;;  %v550_v42 = vpack.c.bf16 %v217_v40, %v216_v39  ;;  %v554_v45 = vpack.c.bf16 %v219_v44, %v218_v43  ;;  %v63_v46 = vld [vmem:[#allocation2 + $0x8] sm:$0xff]  ;;  %v65_v48 = vld [vmem:[#allocation2 + $0x18] sm:$0xff]  ;;  %v66_v49 = vld [vmem:[#allocation2 + $0x20] sm:$0xff] }
  0x42   :  { %509 = vmatpush3.bf16.msra.mxu0 %v506_v8  ;;  %539 = vmatprep.subr.bf16.mxu1 %v538_v25  ;;  %v67_v50 = vld [vmem:[#allocation2 + $0x28] sm:$0xff]  ;;  %v68_v51 = vld [vmem:[#allocation2 + $0x30] sm:$0xff]  ;;  %v69_v52 = vld [vmem:[#allocation2 + $0x38] sm:$0xff] }
  0x43   :  { %511 = vmatprep.subr.bf16.mxu0 %v510_v15  ;;  %v220_v53 = vld [vmem:[#allocation7 + $0x70] sm:$0xff]  ;;  %v221_v54 = vld [vmem:[#allocation7 + $0x78] sm:$0xff]  ;;  %v360_v56 = vld [vmem:[%s773_s2] ss:$0 sm:$0xff] }
  0x44   :  { %v558_v55 = vpack.c.bf16 %v221_v54, %v220_v53  ;;  %v361_v17 = vld [vmem:[%s775_s4] ss:$0 sm:$0xff]  ;;  %s634_s4 = scalar_lea.vmem %s348_s9, 1024 }
  0x45   :  { %541 = vmatpush3.bf16.msra.mxu1 %v538_v25  ;;  %p635_p10 = scmp.ne.s32.totalorder %s348_s9, %s634_s4  ;;  %p640_p12 = scmp.lt.s32.totalorder %s634_s4, %s634_s4 }
  0x46   :  { %513 = vmatpush3.bf16.msra.mxu0 %v510_v15  ;;  %543 = vmatprep.subr.bf16.mxu1 %v542_v31 }
  0x47   :  { %515 = vmatprep.subr.bf16.mxu0 %v514_v23  ;;  %p641_p13 = por %p640_p12, %p639_p11 }
  0x49   :  { %545 = vmatpush3.bf16.msra.mxu1 %v542_v31  ;;  %p642_p0 = pnand %p641_p13, %p635_p10 }
  0x4a   :  { %517 = vmatpush3.bf16.msra.mxu0 %v514_v23  ;;  %547 = vmatprep.subr.bf16.mxu1 %v546_v37 }
  0x4b   :  { %519 = vmatprep.subr.bf16.mxu0 %v518_v29 }
  0x4d   :  { %549 = vmatpush3.bf16.msra.mxu1 %v546_v37 }
  0x4e   :  { %521 = vmatpush3.bf16.msra.mxu0 %v518_v29  ;;  %551 = vmatprep.subr.bf16.mxu1 %v550_v42 }
  0x4f   :  { %523 = vmatprep.subr.bf16.mxu0 %v522_v35 }
  0x51   :  { %553 = vmatpush3.bf16.msra.mxu1 %v550_v42 }
  0x52   :  { %525 = vmatpush3.bf16.msra.mxu0 %v522_v35  ;;  %555 = vmatprep.subr.bf16.mxu1 %v554_v45 }
  0x53   :  { %527 = vmatprep.subr.bf16.mxu0 %v526_v41 }
  0x55   :  { %557 = vmatpush3.bf16.msra.mxu1 %v554_v45 }
  0x56   :  { %529 = vmatpush3.bf16.msra.mxu0 %v526_v41  ;;  %559 = vmatprep.subr.bf16.mxu1 %v558_v55 }
  0x59   :  { %443 = vmatmul.mubr.f32.vlgmr.msra.gmra.mrb[0].mxu0 %v63_v46  ;;  %561 = vmatpush3.bf16.msra.mxu1 %v558_v55 }
  0x5a   :  { %445 = vmatprep.mubr.f32.mxu0 %v64_v47 }
  0x5d   :  { %446 = vmatmul.mubr.f32.gmra.mrb[2].mxu0 %v65_v48 }
  0x5e   :  { %448 = vmatprep.mubr.f32.mxu0 %v66_v49 }
  0x61   :  { %449 = vmatmul.mubr.f32.gmra.mrb[4].mxu0 %v67_v50 }
  0x62   :  { %451 = vmatprep.mubr.f32.mxu0 %v68_v51 }
  0x65   :  { %452 = vmatmul.mubr.f32.gmra.mrb[6].mxu0 %v69_v52 }
 0x12c   :  { %v444_v57 = vpop.f32.mrb[0].mxu0 }
 0x12d   :  { %v165_v58 = vadd.f32 %v444_v57, %v360_v56  ;;  %v159_v59 = vpop.f32.mrb[1].mxu0 }
 0x12e   :  { %v160_v60 = vadd.f32 %v360_v56, %v159_v59 }
 0x12f   :  { %v199_v63 = vmax.f32 %v165_v58, 0.0 }
 0x130   :  { %v447_v61 = vpop.f32.mrb[2].mxu0  ;;  %v198_v62 = vmax.f32 %v160_v60, 0.0 }
 0x131   :  { %v175_v0 = vadd.f32 %v447_v61, %v360_v56  ;;  %v169_v1 = vpop.f32.mrb[3].mxu0 }
 0x132   :  { %v170_v2 = vadd.f32 %v360_v56, %v169_v1  ;;  %486 = vmatprep.mubr.f32.mxu1 %v198_v62 }
 0x133   :  { %487 = vmatmul.mubr.f32.vlgmr.msra.gmra.mrb[0].mxu1 %v199_v63  ;;  %v201_v5 = vmax.f32 %v175_v0, 0.0 }
 0x134   :  { %v200_v3 = vmax.f32 %v170_v2, 0.0  ;;  %v450_v4 = vpop.f32.mrb[4].mxu0 }
 0x135   :  { %v185_v6 = vadd.f32 %v450_v4, %v360_v56  ;;  %v179_v7 = vpop.f32.mrb[5].mxu0 }
 0x136   :  { %v180_v8 = vadd.f32 %v360_v56, %v179_v7  ;;  %489 = vmatprep.mubr.f32.mxu1 %v200_v3 }
 0x137   :  { %490 = vmatmul.mubr.f32.gmra.mrb[2].mxu1 %v201_v5  ;;  %v203_v11 = vmax.f32 %v185_v6, 0.0 }
 0x138   :  { %v202_v9 = vmax.f32 %v180_v8, 0.0  ;;  %v453_v10 = vpop.f32.mrb[6].mxu0 }
 0x139   :  { %v195_v12 = vadd.f32 %v453_v10, %v360_v56  ;;  %v189_v13 = vpop.f32.mrb[7].mxu0 }
 0x13a   :  { %v190_v14 = vadd.f32 %v360_v56, %v189_v13  ;;  %492 = vmatprep.mubr.f32.mxu1 %v202_v9 }
 0x13b   :  { %493 = vmatmul.mubr.f32.gmra.mrb[4].mxu1 %v203_v11  ;;  %v205_v16 = vmax.f32 %v195_v12, 0.0 }
 0x13c   :  { %v204_v15 = vmax.f32 %v190_v14, 0.0 }
 0x13e   :  { %495 = vmatprep.mubr.f32.mxu1 %v204_v15 }
 0x13f   :  { %496 = vmatmul.mubr.f32.gmra.mrb[6].mxu1 %v205_v16 }
 0x206   :  { %v488_v18 = vpop.f32.mrb[0].mxu1 }
 0x207   :  { %v301_v19 = vadd.f32 %v488_v18, %v361_v17  ;;  %v295_v20 = vpop.f32.mrb[1].mxu1 }
 0x208   :  { %v296_v21 = vadd.f32 %v361_v17, %v295_v20 }
 0x209   :  { %335 = vst [vmem:[#allocation8 + $0x8] sm:$0xff] %v301_v19 }
 0x20a   :  { %334 = vst [vmem:[#allocation8] sm:$0xff] %v296_v21  ;;  %v491_v22 = vpop.f32.mrb[2].mxu1 }
 0x20b   :  { %v311_v23 = vadd.f32 %v491_v22, %v361_v17  ;;  %v305_v24 = vpop.f32.mrb[3].mxu1 }
 0x20c   :  { %v306_v25 = vadd.f32 %v361_v17, %v305_v24 }
 0x20d   :  { %337 = vst [vmem:[#allocation8 + $0x18] sm:$0xff] %v311_v23 }
 0x20e   :  { %336 = vst [vmem:[#allocation8 + $0x10] sm:$0xff] %v306_v25  ;;  %v494_v26 = vpop.f32.mrb[4].mxu1 }
 0x20f   :  { %v321_v27 = vadd.f32 %v494_v26, %v361_v17  ;;  %v315_v28 = vpop.f32.mrb[5].mxu1 }
 0x210   :  { %v316_v29 = vadd.f32 %v361_v17, %v315_v28 }
 0x211   :  { %339 = vst [vmem:[#allocation8 + $0x28] sm:$0xff] %v321_v27 }
 0x212   :  { %338 = vst [vmem:[#allocation8 + $0x20] sm:$0xff] %v316_v29  ;;  %v497_v30 = vpop.f32.mrb[6].mxu1 }
 0x213   :  { %v331_v31 = vadd.f32 %v497_v30, %v361_v17  ;;  %v325_v32 = vpop.f32.mrb[7].mxu1 }
 0x214   :  { %v326_v33 = vadd.f32 %v361_v17, %v325_v32 }
 0x215   :  { %341 = vst [vmem:[#allocation8 + $0x38] sm:$0xff] %v331_v31 }
 0x216   :  { %340 = vst [vmem:[#allocation8 + $0x30] sm:$0xff] %v326_v33 }
 0x217   :  { %645 = shalt.err (!%p642_p0)
}
 0x218   :  { %s646_s12 = scalar_lea.hbm %s776_s5, 1024 }
 0x219   :  { %p647_p1 = scmp.ne.s32.totalorder %s776_s5, %s646_s12  ;;  %p650_p2 = scmp.lt.u32.totalorder %s646_s12, %s776_s5 }
 0x21b   :  { %p652_p3 = pnand %p650_p2, %p647_p1 }
 0x21d   :  { %655 = shalt.err (!%p652_p3)
}
 0x21e   :  { %353 = dma.vmem_to_hbm [thread:$0]  %s348_s9, 1024, %s776_s5, [#allocation4], %s664_s30, %s664_s30, %s665_s6  }
 0x21f   :  { %660 = dma.done.wait [#allocation4], 1024  }
 0x220   :  { %661 = vsyncadd [#allocation4], 4294966272 }
 0x221   :  { %357 = vsyncpa [#allocation3], 1 }
 0x222   :  { %358 = vsyncpa [#allocation6], 1 }
 0x223   :  { %359 = vsyncpa [#allocation4], 1 }

</bundles_post_ra>
